<compile_context>
chip_gen: v7x
topology: tpu7x:2x2x1
jax: 0.10.0
libtpu: 0.0.40
codegen_flags: <defaults>
</compile_context>

<pallas_src>
import functools

import jax
import jax.numpy as jnp
from jax.experimental import pallas as pl
from jax.experimental.pallas import tpu as pltpu


def _round_up(n, m):
    return ((n + m - 1) // m) * m


def _cdiv(a, b):
    return (a + b - 1) // b


def _pad_to(a, shape):
    pads = [(0, s - d) for d, s in zip(a.shape, shape)]
    if all(p == (0, 0) for p in pads):
        return a
    return jnp.pad(a, pads)


def statnet_kernel(x_ref, w1_ref, b1_ref, w2_ref, b2_ref, o_ref):
    # Cast the streamed activation tile to the weight dtype (bf16 fast path);
    # weights were cast once in the wrapper, not per grid step.
    x = x_ref[...].astype(w1_ref.dtype)

    # Layer 1: MXU matmul with f32 accumulation, bias + ReLU on the VPU.
    h = jnp.dot(x, w1_ref[...], preferred_element_type=jnp.float32)
    h = jnp.maximum(h + b1_ref[...], 0.0)

    # Layer 2.
    o = jnp.dot(h.astype(w2_ref.dtype), w2_ref[...],
                preferred_element_type=jnp.float32)
    o = jnp.maximum(o + b2_ref[...], 0.0)

    o_ref[...] = o.astype(o_ref.dtype)


@functools.partial(jax.jit, static_argnames=("block_b", "use_bf16"))
def statnet_forward(x, w1, b1, w2, b2, *, block_b=2048, use_bf16=True):
    """x: [B, in]; w1: [in, out]; b1: [1, out]; w2: [out, out]; b2: [1, out]."""
    B, in_size = x.shape
    out_size = w1.shape[1]
    dt = x.dtype
    f32b = 4

    # Pad the output-feature axis to a multiple of 128 only when it is large
    # enough that lane-dense stores beat the extra HBM write volume.
    out_p = _round_up(out_size, 128) if out_size >= 256 else out_size

    # Weights cast once in the wrapper (bf16 MXU fast path on v5e/v6e/v7x);
    # biases stay f32 (added to the f32 accumulator).
    wdt = jnp.bfloat16 if use_bf16 else dt
    w1p = _pad_to(w1, (in_size, out_p)).astype(wdt)
    w2p = _pad_to(w2, (out_p, out_p)).astype(wdt)
    b1p = _pad_to(b1, (1, out_p)).astype(jnp.float32)
    b2p = _pad_to(b2, (1, out_p)).astype(jnp.float32)

    # Batch tiling: split B evenly across tiles (no round_up(B, tb) waste),
    # sublane-aligned, and prefer >= 2 grid steps so both v7x TCs get work.
    min_tile = 8
    b8 = _round_up(B, min_tile)
    n_b = _cdiv(B, block_b)
    if n_b == 1 and b8 >= 2 * min_tile:
        n_b = 2
    tb = _round_up(_cdiv(B, n_b), min_tile)
    b_pad = n_b * tb
    xp = _pad_to(x, (b_pad, in_size))

    x_item = jnp.dtype(dt).itemsize
    w_item = jnp.dtype(wdt).itemsize
    cost = pl.CostEstimate(
        flops=2 * b_pad * (in_size * out_p + out_p * out_p),
        transcendentals=0,
        bytes_accessed=(xp.size * x_item + w1p.size * w_item
                        + w2p.size * w_item + (b1p.size + b2p.size) * f32b
                        + b_pad * out_p * x_item),
    )
    out_shape = jax.ShapeDtypeStruct((b_pad, out_p), dt)

    # Resident weight/bias bytes (single-buffered) shared by both paths.
    weight_bytes = (in_size * out_p + out_p * out_p) * w_item + 2 * out_p * f32b

    if n_b == 1:
        # Single minimum-size tile: no grid, no pipeline machinery; everything
        # VMEM-resident for the duration of the call.
        need = (b_pad * in_size * x_item          # x
                + b_pad * out_p * x_item          # out
                + weight_bytes                    # w1, w2, b1, b2
                + 3 * b_pad * out_p * f32b)       # h / cast / o intermediates
        vmem_limit = max(min(int(1.5 * need) + (4 << 20), 64 << 20), 16 << 20)
        out_pad = pl.pallas_call(
            statnet_kernel,
            out_shape=out_shape,
            in_specs=[pl.BlockSpec(memory_space=pltpu.MemorySpace.VMEM)] * 5,
            out_specs=pl.BlockSpec(memory_space=pltpu.MemorySpace.VMEM),
            compiler_params=pltpu.CompilerParams(vmem_limit_bytes=vmem_limit),
            cost_estimate=cost,
        )(xp, w1p, b1p, w2p, b2p)
    else:
        # Stream batch tiles (double-buffered) through single-buffered,
        # VMEM-resident weights; batch axis is "parallel" (v7x megacore).
        need = (2 * tb * in_size * x_item         # x (double-buffered)
                + 2 * tb * out_p * x_item         # out (double-buffered)
                + weight_bytes                    # w1, w2, b1, b2 (x1)
                + 3 * tb * out_p * f32b)          # h / cast / o intermediates
        vmem_limit = max(min(int(1.5 * need) + (4 << 20), 64 << 20), 16 << 20)
        # TODO(synk): for very large out_size (f32/bf16 w2 approaching the
        # per-TC VMEM budget) add an N-axis grid dimension instead of keeping
        # w2 fully resident.
        resident = dict(pipeline_mode=pl.Buffered(1))
        out_pad = pl.pallas_call(
            statnet_kernel,
            out_shape=out_shape,
            grid=(n_b,),
            in_specs=[
                pl.BlockSpec((tb, in_size), lambda i: (i, 0)),
                pl.BlockSpec((in_size, out_p), lambda i: (0, 0), **resident),
                pl.BlockSpec((1, out_p), lambda i: (0, 0), **resident),
                pl.BlockSpec((out_p, out_p), lambda i: (0, 0), **resident),
                pl.BlockSpec((1, out_p), lambda i: (0, 0), **resident),
            ],
            out_specs=pl.BlockSpec((tb, out_p), lambda i: (i, 0)),
            compiler_params=pltpu.CompilerParams(
                dimension_semantics=("parallel",),
                vmem_limit_bytes=vmem_limit,
            ),
            cost_estimate=cost,
        )(xp, w1p, b1p, w2p, b2p)

    return out_pad[:B, :out_size]


def init_params(key, in_size, out_size, dtype=jnp.float32):
    # Mimics nn.Linear's uniform(-1/sqrt(fan_in), 1/sqrt(fan_in)) init.
    k1, k2, k3, k4 = jax.random.split(key, 4)
    bound1 = 1.0 / jnp.sqrt(in_size)
    bound2 = 1.0 / jnp.sqrt(out_size)
    w1 = jax.random.uniform(k1, (in_size, out_size), dtype, -bound1, bound1)
    b1 = jax.random.uniform(k2, (1, out_size), dtype, -bound1, bound1)
    w2 = jax.random.uniform(k3, (out_size, out_size), dtype, -bound2, bound2)
    b2 = jax.random.uniform(k4, (1, out_size), dtype, -bound2, bound2)
    return w1, b1, w2, b2


def _reference_f32(x, w1, b1, w2, b2):
    h = jnp.maximum(x @ w1 + b1, 0.0)
    return jnp.maximum(h @ w2 + b2, 0.0)


def _reference_bf16(x, w1, b1, w2, b2):
    # Same mixed-precision recipe as the kernel: bf16 operands, f32 accum.
    xb, w1b, w2b = (a.astype(jnp.bfloat16) for a in (x, w1, w2))
    h = jnp.dot(xb, w1b, preferred_element_type=jnp.float32) + b1
    h = jnp.maximum(h, 0.0)
    o = jnp.dot(h.astype(jnp.bfloat16), w2b,
                preferred_element_type=jnp.float32) + b2
    return jnp.maximum(o, 0.0)


if __name__ == "__main__":
    key = jax.random.PRNGKey(0)
    kx, kp, kx2 = jax.random.split(key, 3)

    in_size, out_size = 32, 32
    w1, b1, w2, b2 = init_params(kp, in_size, out_size)

    # Case 1: tiny batch -> single-tile, gridless path.
    x = jax.random.normal(kx, (8, in_size), dtype=jnp.float32)
    out = jax.block_until_ready(statnet_forward(x, w1, b1, w2, b2))
    assert out.shape == (8, out_size)
    assert jnp.allclose(out, _reference_bf16(x, w1, b1, w2, b2),
                        atol=2e-2, rtol=2e-2)
    assert jnp.allclose(out, _reference_f32(x, w1, b1, w2, b2),
                        atol=5e-2, rtol=5e-2)

    # Case 2: larger batch with a small tile -> batch-tiled grid path
    # (single-buffered resident weights, "parallel" batch axis).
    x2 = jax.random.normal(kx2, (40, in_size), dtype=jnp.float32)
    out2 = jax.block_until_ready(
        statnet_forward(x2, w1, b1, w2, b2, block_b=16))
    assert out2.shape == (40, out_size)
    assert jnp.allclose(out2, _reference_bf16(x2, w1, b1, w2, b2),
                        atol=2e-2, rtol=2e-2)
    assert jnp.allclose(out2, _reference_f32(x2, w1, b1, w2, b2),
                        atol=5e-2, rtol=5e-2)

    # Full-precision fallback path (use_bf16=False) also supported.
    out3 = jax.block_until_ready(
        statnet_forward(x2, w1, b1, w2, b2, block_b=16, use_bf16=False))
    assert jnp.allclose(out3, _reference_f32(x2, w1, b1, w2, b2),
                        atol=1e-5, rtol=1e-5)

    print("KERNEL_OK")
</pallas_src>

<mosaic_0001>
module attributes {stable_mosaic.version = 11 : i64} {
  func.func @statnet_kernel(%arg0: memref<8x32xf32, #tpu.memory_space<vmem>>, %arg1: memref<32x32xbf16, #tpu.memory_space<vmem>>, %arg2: memref<1x32xf32, #tpu.memory_space<vmem>>, %arg3: memref<32x32xbf16, #tpu.memory_space<vmem>>, %arg4: memref<1x32xf32, #tpu.memory_space<vmem>>, %arg5: memref<8x32xf32, #tpu.memory_space<vmem>>) attributes {dimension_semantics = [], scalar_prefetch = 0 : i64, scratch_operands = 0 : i64, tpu.core_type = #tpu.core_type<tc>} {
    %c0 = arith.constant 0 : index
    %c0_0 = arith.constant 0 : index
    %0 = vector.load %arg0[%c0, %c0_0] : memref<8x32xf32, #tpu.memory_space<vmem>>, vector<8x32xf32>
    %1 = arith.truncf %0 : vector<8x32xf32> to vector<8x32xbf16>
    %c0_1 = arith.constant 0 : index
    %c0_2 = arith.constant 0 : index
    %2 = vector.load %arg1[%c0_1, %c0_2] : memref<32x32xbf16, #tpu.memory_space<vmem>>, vector<32x32xbf16>
    %cst = arith.constant dense<0.000000e+00> : vector<8x32xf32>
    %3 = tpu.matmul %1, %2, %cst {dimension_numbers = #tpu.dot_dimension_numbers<[1], [0], [0], [1], [0, 0, 1, 1], [], []>} : vector<8x32xbf16>, vector<32x32xbf16>, vector<8x32xf32> -> vector<8x32xf32>
    %c0_3 = arith.constant 0 : index
    %c0_4 = arith.constant 0 : index
    %4 = vector.load %arg2[%c0_3, %c0_4] : memref<1x32xf32, #tpu.memory_space<vmem>>, vector<1x32xf32>
    %5 = vector.broadcast %4 : vector<1x32xf32> to vector<8x32xf32>
    %6 = arith.addf %3, %5 : vector<8x32xf32>
    %cst_5 = arith.constant 0.000000e+00 : f32
    %7 = vector.broadcast %cst_5 : f32 to vector<8x32xf32>
    %8 = arith.maximumf %6, %7 : vector<8x32xf32>
    %9 = arith.truncf %8 : vector<8x32xf32> to vector<8x32xbf16>
    %c0_6 = arith.constant 0 : index
    %c0_7 = arith.constant 0 : index
    %10 = vector.load %arg3[%c0_6, %c0_7] : memref<32x32xbf16, #tpu.memory_space<vmem>>, vector<32x32xbf16>
    %cst_8 = arith.constant dense<0.000000e+00> : vector<8x32xf32>
    %11 = tpu.matmul %9, %10, %cst_8 {dimension_numbers = #tpu.dot_dimension_numbers<[1], [0], [0], [1], [0, 0, 1, 1], [], []>} : vector<8x32xbf16>, vector<32x32xbf16>, vector<8x32xf32> -> vector<8x32xf32>
    %c0_9 = arith.constant 0 : index
    %c0_10 = arith.constant 0 : index
    %12 = vector.load %arg4[%c0_9, %c0_10] : memref<1x32xf32, #tpu.memory_space<vmem>>, vector<1x32xf32>
    %13 = vector.broadcast %12 : vector<1x32xf32> to vector<8x32xf32>
    %14 = arith.addf %11, %13 : vector<8x32xf32>
    %cst_11 = arith.constant 0.000000e+00 : f32
    %15 = vector.broadcast %cst_11 : f32 to vector<8x32xf32>
    %16 = arith.maximumf %14, %15 : vector<8x32xf32>
    %c0_12 = arith.constant 0 : index
    %c0_13 = arith.constant 0 : index
    %17 = vector.load %arg5[%c0_12, %c0_13] : memref<8x32xf32, #tpu.memory_space<vmem>>, vector<8x32xf32>
    tpu.vector_store %arg5[%c0_12, %c0_13], %16 {strides = array<i32>} : memref<8x32xf32, #tpu.memory_space<vmem>>, vector<8x32xf32>,
    return
  }
}

</mosaic_0001>

<bundles_post_ra>
// kernel: statnet_forward.1
= control target key start
LH: loop header
LB: loop body
LE: loop exit
PB: predicated region body
PF: predicated region fallthrough
CT: control target
= control target key end

     0   :  { %v236_v1 = vmov 0.0   ;;  %vm237_vm0 = vmmov 0   ;;  %s305_s0 = inlined_call_operand.vmem [shape: f32[8,32], index: 0, kind: input, shape index: {}]   ;;  %s306_s1 = inlined_call_operand.vmem [shape: bf16[32,32], index: 1, kind: input, shape index: {}]   ;;  %s307_s2 = inlined_call_operand.vmem [shape: f32[1,32], index: 2, kind: input, shape index: {}]   ;;  %s308_s3 = inlined_call_operand.vmem [shape: bf16[32,32], index: 3, kind: input, shape index: {}]   ;;  %s309_s4 = inlined_call_operand.vmem [shape: f32[1,32], index: 4, kind: input, shape index: {}]   ;;  %s310_s5 = inlined_call_operand.hbm [shape: f32[8,32], index: 5, kind: output, shape index: {}]  }
   0x1   :  { %v208_v0 = vld [vmem:[%s306_s1] sm:$0xff]   ;;  %189 = vmatprep.subr.bf16.mxu0 %v236_v1  ;;  %197 = vmatprep.subr.bf16.mxu1 %v236_v1  ;;  %v209_v2 = vld [vmem:[%s306_s1 + $0x8] sm:$0xff]  }
   0x2   :  { %190 = vmatpush3.bf16.msra.mxu0 %v208_v0  ;;  %193 = vmatprep.mubr.msk.bf16.mxu0 %vm237_vm0, %v236_v1  ;;  %v22_v3 = vld [vmem:[%s305_s0] sm:$0xff] }
   0x3   :  { %191 = vmatprep.subr.bf16.mxu0 %v236_v1  ;;  %201 = vmatprep.mubr.msk.bf16.mxu1 %vm237_vm0, %v236_v1 }
   0x4   :  { %10 = vsyncpa [#allocation3], 0  ;;  %v23_v4 = vpack.c.bf16 %v22_v3, %v22_v3  ;;  %vm47_vm1 = vcmask 261120   ;;  %v210_v5 = vld [vmem:[%s308_s3] sm:$0xff]   ;;  %v211_v6 = vld [vmem:[%s308_s3 + $0x8] sm:$0xff]   ;;  %s238_s3 = smov [#allocation2]  }
   0x5   :  { %198 = vmatpush3.bf16.msra.mxu1 %v210_v5  ;;  %v175_v7 = vld [vmem:[%s307_s2] ss:$0 sm:$0xff]  ;;  %s167_s30 = sshll.u32 %s238_s3, 4  ;;  %s168_s30 = int_to_ptr.vmem [resolvable:$true] %s167_s30 }
   0x6   :  { %192 = vmatpush3.bf16.msra.mxu0 %v209_v2  ;;  %199 = vmatprep.subr.bf16.mxu1 %v236_v1  ;;  %v179_v15 = vld [vmem:[%s309_s4] ss:$0 sm:$0xff]  ;;  %s212_s2 = scalar_lea.vmem %s168_s30, 128  ;;  %p217_p1 = scmp.lt.s32.totalorder %s168_s30, %s168_s30 }
   0x7   :  { %p213_p0 = scmp.ne.s32.totalorder %s168_s30, %s212_s2  ;;  %p218_p2 = scmp.lt.s32.totalorder %s212_s2, %s212_s2 }
   0x9   :  { %194 = vmatmul.mubr.msk.bf16.vlgmr.msra.gmra.mrb[0].mxu0 %vm47_vm1, %v23_v4  ;;  %200 = vmatpush3.bf16.msra.mxu1 %v211_v6  ;;  %p219_p3 = por %p218_p2, %p217_p1 }
   0xb   :  { %p220_p4 = pnand %p219_p3, %p213_p0 }
  0xdc   :  { %v85_v8 = vpop.f32.mrb[0].mxu0 }
  0xdd   :  { %v86_v9 = vadd.f32 %v175_v7, %v85_v8  ;;  %v195_v10 = vpop.f32.mrb[1].mxu0 }
  0xde   :  { %v88_v11 = vpop.f32.mrb[2].mxu0 }
  0xdf   :  { %v91_v12 = vmax.f32 %v86_v9, 0.0  ;;  %v196_v13 = vpop.f32.mrb[3].mxu0 }
  0xe1   :  { %v92_v14 = vpack.c.bf16 %v91_v12, %v91_v12 }
  0xe3   :  { %202 = vmatmul.mubr.msk.bf16.vlgmr.msra.gmra.mrb[0].mxu1 %vm47_vm1, %v92_v14 }
 0x1b6   :  { %v153_v16 = vpop.f32.mrb[0].mxu1 }
 0x1b7   :  { %v154_v17 = vadd.f32 %v179_v15, %v153_v16  ;;  %v203_v18 = vpop.f32.mrb[1].mxu1 }
 0x1b8   :  { %v156_v19 = vpop.f32.mrb[2].mxu1 }
 0x1b9   :  { %v159_v20 = vmax.f32 %v154_v17, 0.0  ;;  %v204_v21 = vpop.f32.mrb[3].mxu1 }
 0x1bb   :  { %160 = vst.msk [vmem:[#allocation2] sm:$0xff] %vm47_vm1, %v159_v20 }
 0x1bc   :  { %223 = shalt.err (!%p220_p4)
}
 0x1bd   :  { %s224_s7 = scalar_lea.hbm %s310_s5, 128 }
 0x1be   :  { %p225_p5 = scmp.ne.s32.totalorder %s310_s5, %s224_s7  ;;  %p228_p6 = scmp.lt.u32.totalorder %s224_s7, %s310_s5 }
 0x1c0   :  { %p230_p7 = pnand %p228_p6, %p225_p5 }
 0x1c2   :  { %233 = shalt.err (!%p230_p7)
}
 0x1c3   :  { %170 = dma.vmem_to_hbm [thread:$0]  %s168_s30, 128, %s310_s5, [#allocation3]  }
 0x1c4   :  { %234 = dma.done.wait [#allocation3], 128  }
 0x1c5   :  { %235 = vsyncadd [#allocation3], 4294967168 }
 0x1c6   :  { %174 = vsyncpa [#allocation3], 1 }

</bundles_post_ra>
